<compile_context>
chip_gen: v5e
topology: v5e:2x2
jax: 0.10.0
libtpu: 0.0.40
codegen_flags: <defaults>
</compile_context>

<pallas_src>
import jax
import jax.numpy as jnp
from jax.experimental import pallas as pl
from jax.experimental.pallas import tpu as pltpu

INPUT_SIZE = 784
HIDDEN_SIZE = 100
OUTPUT_SIZE = 10

LANE = 128
SUBLANE = 8


def _round_up(x, m):
    return ((x + m - 1) // m) * m


H_PAD = _round_up(HIDDEN_SIZE, LANE)   # 128 (hidden padded with zeros)


def mlp_kernel(x_ref, w1_ref, b1_ref, w2_ref, b2_ref, o_ref):
    # Layer 1 on the MXU: (TM, 784) @ (784, 128), f32 accumulate.
    h = jnp.dot(x_ref[...], w1_ref[...], preferred_element_type=jnp.float32)
    # Bias + ReLU fused on the VPU in f32 (padded hidden lanes are 0 -> stay 0).
    h = jnp.maximum(h + b1_ref[...], 0.0)
    # Layer 2 on the MXU: (TM, 128) @ (128, 10), f32 accumulate.
    out = jnp.dot(h.astype(w2_ref.dtype), w2_ref[...],
                  preferred_element_type=jnp.float32)
    # Store only the 10 real output columns (40 B/row instead of 512 B/row).
    o_ref[...] = (out + b2_ref[...]).astype(o_ref.dtype)


def prepare_params(w1, b1, w2, b2, compute_dtype=jnp.bfloat16):
    """One-time (host-side) packing of weights/biases.

    w1 -> (784, 128) compute_dtype, hidden padded with zeros.
    b1 -> (1, 128)   f32, padded with zeros.
    w2 -> (128, 10)  compute_dtype, padded hidden rows are zeros.
    b2 -> (1, 10)    f32.
    """
    w1p = jnp.zeros((INPUT_SIZE, H_PAD), compute_dtype)
    w1p = w1p.at[:, :HIDDEN_SIZE].set(w1.astype(compute_dtype))
    b1p = jnp.zeros((1, H_PAD), jnp.float32)
    b1p = b1p.at[:, :HIDDEN_SIZE].set(b1.reshape(1, -1).astype(jnp.float32))
    w2p = jnp.zeros((H_PAD, OUTPUT_SIZE), compute_dtype)
    w2p = w2p.at[:HIDDEN_SIZE, :].set(w2.astype(compute_dtype))
    b2p = b2.reshape(1, -1).astype(jnp.float32)
    return w1p, b1p, w2p, b2p


def mlp_forward(x, w1p, b1p, w2p, b2p, *, tm=4096):
    """x: (B, 784); packed params from prepare_params. Returns (B, 10) f32."""
    B = x.shape[0]
    compute_dtype = w1p.dtype
    itemsize = jnp.dtype(compute_dtype).itemsize

    # --- batch tile selection -------------------------------------------------
    tm = _round_up(tm, SUBLANE)
    b_sub = _round_up(B, SUBLANE)
    tm = min(tm, b_sub)
    # v7x: if the batch is big enough, keep >= 2 grid steps so the "parallel"
    # batch axis actually shards across both TensorCores (no-op on v5e/v6e).
    if b_sub >= 512:
        tm = min(tm, _round_up(pl.cdiv(b_sub, 2), 256))
    tm = max(tm, SUBLANE)

    grid_m = pl.cdiv(B, tm)
    b_pad = grid_m * tm

    # --- input: cast to compute dtype; pad batch ONLY if needed ---------------
    xc = x if x.dtype == compute_dtype else x.astype(compute_dtype)
    if b_pad != B:
        xp = jnp.zeros((b_pad, INPUT_SIZE), compute_dtype)
        xp = xp.at[:B, :].set(xc)
    else:
        xp = xc

    # --- VMEM budget: raise the scoped limit only when the tiles need it ------
    vmem_need = (2 * tm * INPUT_SIZE * itemsize          # double-buffered x tiles
                 + 2 * tm * OUTPUT_SIZE * 4              # double-buffered out tiles
                 + 2 * (INPUT_SIZE * H_PAD + H_PAD * OUTPUT_SIZE) * itemsize
                 + 2 * (H_PAD + OUTPUT_SIZE) * 4         # weights + biases
                 + tm * H_PAD * 4)                       # f32 hidden intermediate
    vmem_limit = None
    if vmem_need > 30 * 1024 * 1024:
        vmem_limit = min(int(vmem_need * 5 // 4), 100 * 1024 * 1024)

    cost = pl.CostEstimate(
        flops=2 * b_pad * (INPUT_SIZE * H_PAD + H_PAD * OUTPUT_SIZE),
        transcendentals=0,
        bytes_accessed=(b_pad * INPUT_SIZE * itemsize                      # x
                        + (INPUT_SIZE * H_PAD + H_PAD * OUTPUT_SIZE) * itemsize
                        + (H_PAD + OUTPUT_SIZE) * 4                        # biases
                        + b_pad * OUTPUT_SIZE * 4),                        # out
    )

    out = pl.pallas_call(
        mlp_kernel,
        out_shape=jax.ShapeDtypeStruct((b_pad, OUTPUT_SIZE), jnp.float32),
        grid_spec=pltpu.PrefetchScalarGridSpec(
            num_scalar_prefetch=0,
            grid=(grid_m,),
            in_specs=[
                # x: batch-tiled, full 784-wide rows (contiguous HBM stream).
                pl.BlockSpec((tm, INPUT_SIZE), lambda i: (i, 0)),
                # Weights / biases: constant index_map -> VMEM-resident.
                pl.BlockSpec((INPUT_SIZE, H_PAD), lambda i: (0, 0)),
                pl.BlockSpec((1, H_PAD), lambda i: (0, 0)),
                pl.BlockSpec((H_PAD, OUTPUT_SIZE), lambda i: (0, 0)),
                pl.BlockSpec((1, OUTPUT_SIZE), lambda i: (0, 0)),
            ],
            # Full-dim (10-wide) last block: only the real columns hit HBM.
            out_specs=pl.BlockSpec((tm, OUTPUT_SIZE), lambda i: (i, 0)),
        ),
        compiler_params=pltpu.CompilerParams(
            dimension_semantics=("parallel",),   # batch shards across TCs on v7x
            vmem_limit_bytes=vmem_limit,
        ),
        cost_estimate=cost,
    )(xp, w1p, b1p, w2p, b2p)

    return out if b_pad == B else out[:B]


def init_params(key):
    # Deterministic init mimicking torch.nn.Linear default:
    # U(-1/sqrt(fan_in), 1/sqrt(fan_in)); stored pre-transposed as (in, out).
    k1, k2, k3, k4 = jax.random.split(key, 4)
    bound1 = 1.0 / (INPUT_SIZE ** 0.5)
    bound2 = 1.0 / (HIDDEN_SIZE ** 0.5)
    w1 = jax.random.uniform(k1, (INPUT_SIZE, HIDDEN_SIZE), jnp.float32,
                            -bound1, bound1)
    b1 = jax.random.uniform(k2, (1, HIDDEN_SIZE), jnp.float32, -bound1, bound1)
    w2 = jax.random.uniform(k3, (HIDDEN_SIZE, OUTPUT_SIZE), jnp.float32,
                            -bound2, bound2)
    b2 = jax.random.uniform(k4, (1, OUTPUT_SIZE), jnp.float32, -bound2, bound2)
    return w1, b1, w2, b2


if __name__ == "__main__":
    key = jax.random.PRNGKey(0)
    kx, kp = jax.random.split(key)
    batch = 8
    x = jax.random.normal(kx, (batch, INPUT_SIZE), jnp.float32)
    w1, b1, w2, b2 = init_params(kp)

    # Plain-JAX reference of the PyTorch forward.
    ref = jnp.maximum(x @ w1 + b1, 0.0) @ w2 + b2

    fwd = jax.jit(mlp_forward)   # single dispatch: cast + pallas_call (+slice)

    # 1) f32 operands: tight check that the kernel math matches the module.
    p_f32 = prepare_params(w1, b1, w2, b2, compute_dtype=jnp.float32)
    out_f32 = jax.block_until_ready(fwd(x, *p_f32))
    assert out_f32.shape == (batch, OUTPUT_SIZE)
    assert jnp.allclose(out_f32, ref, atol=1e-4, rtol=1e-4)

    # 2) bf16 operands (the default / production config): ~2x less HBM traffic,
    #    f32 accumulation keeps the error within bf16 rounding of the inputs.
    p_bf16 = prepare_params(w1, b1, w2, b2)            # bfloat16 default
    out_bf16 = jax.block_until_ready(fwd(x, *p_bf16))
    assert out_bf16.shape == (batch, OUTPUT_SIZE)
    assert jnp.allclose(out_bf16, ref, atol=5e-2, rtol=5e-2)

    print("KERNEL_OK")
</pallas_src>

<mosaic_0001>
module attributes {stable_mosaic.version = 11 : i64} {
  func.func @mlp_kernel(%arg0: i32, %arg1: memref<8x784xf32, #tpu.memory_space<vmem>>, %arg2: memref<784x128xf32, #tpu.memory_space<vmem>>, %arg3: memref<1x128xf32, #tpu.memory_space<vmem>>, %arg4: memref<128x10xf32, #tpu.memory_space<vmem>>, %arg5: memref<1x10xf32, #tpu.memory_space<vmem>>, %arg6: memref<8x10xf32, #tpu.memory_space<vmem>>) attributes {dimension_semantics = [#tpu.dimension_semantics<parallel>], iteration_bounds = array<i64: 1>, scalar_prefetch = 0 : i64, scratch_operands = 0 : i64, tpu.core_type = #tpu.core_type<tc>, window_params = [{transform_indices = @transform_0, window_bounds = array<i64: 8, 784>}, {pipeline_mode = #tpu.pipeline_mode<synchronous>, transform_indices = @transform_1, window_bounds = array<i64: 784, 128>}, {pipeline_mode = #tpu.pipeline_mode<synchronous>, transform_indices = @transform_2, window_bounds = array<i64: 1, 128>}, {pipeline_mode = #tpu.pipeline_mode<synchronous>, transform_indices = @transform_3, window_bounds = array<i64: 128, 10>}, {pipeline_mode = #tpu.pipeline_mode<synchronous>, transform_indices = @transform_4, window_bounds = array<i64: 1, 10>}, {transform_indices = @transform_5, window_bounds = array<i64: 8, 10>}]} {
    %c0 = arith.constant 0 : index
    %c0_0 = arith.constant 0 : index
    %0 = vector.load %arg1[%c0, %c0_0] : memref<8x784xf32, #tpu.memory_space<vmem>>, vector<8x784xf32>
    %c0_1 = arith.constant 0 : index
    %c0_2 = arith.constant 0 : index
    %1 = vector.load %arg2[%c0_1, %c0_2] : memref<784x128xf32, #tpu.memory_space<vmem>>, vector<784x128xf32>
    %cst = arith.constant dense<0.000000e+00> : vector<8x128xf32>
    %2 = tpu.matmul %0, %1, %cst {dimension_numbers = #tpu.dot_dimension_numbers<[1], [0], [0], [1], [0, 0, 1, 1], [], []>} : vector<8x784xf32>, vector<784x128xf32>, vector<8x128xf32> -> vector<8x128xf32>
    %c0_3 = arith.constant 0 : index
    %c0_4 = arith.constant 0 : index
    %3 = vector.load %arg3[%c0_3, %c0_4] : memref<1x128xf32, #tpu.memory_space<vmem>>, vector<1x128xf32>
    %4 = vector.broadcast %3 : vector<1x128xf32> to vector<8x128xf32>
    %5 = arith.addf %2, %4 : vector<8x128xf32>
    %cst_5 = arith.constant 0.000000e+00 : f32
    %6 = vector.broadcast %cst_5 : f32 to vector<8x128xf32>
    %7 = arith.maximumf %5, %6 : vector<8x128xf32>
    %c0_6 = arith.constant 0 : index
    %c0_7 = arith.constant 0 : index
    %8 = vector.load %arg4[%c0_6, %c0_7] : memref<128x10xf32, #tpu.memory_space<vmem>>, vector<128x10xf32>
    %cst_8 = arith.constant dense<0.000000e+00> : vector<8x10xf32>
    %9 = tpu.matmul %7, %8, %cst_8 {dimension_numbers = #tpu.dot_dimension_numbers<[1], [0], [0], [1], [0, 0, 1, 1], [], []>} : vector<8x128xf32>, vector<128x10xf32>, vector<8x10xf32> -> vector<8x10xf32>
    %c0_9 = arith.constant 0 : index
    %c0_10 = arith.constant 0 : index
    %10 = vector.load %arg5[%c0_9, %c0_10] : memref<1x10xf32, #tpu.memory_space<vmem>>, vector<1x10xf32>
    %11 = vector.broadcast %10 : vector<1x10xf32> to vector<8x10xf32>
    %12 = arith.addf %9, %11 : vector<8x10xf32>
    %c0_11 = arith.constant 0 : index
    %c0_12 = arith.constant 0 : index
    %13 = vector.load %arg6[%c0_11, %c0_12] : memref<8x10xf32, #tpu.memory_space<vmem>>, vector<8x10xf32>
    tpu.vector_store %arg6[%c0_11, %c0_12], %12 {strides = array<i32>} : memref<8x10xf32, #tpu.memory_space<vmem>>, vector<8x10xf32>,
    return
  }
  func.func @transform_0(%arg0: i32) -> (i32, i32) {
    %c0_i32 = arith.constant 0 : i32
    %c0_i32_0 = arith.constant 0 : i32
    return %arg0, %c0_i32 : i32, i32
  }
  func.func @transform_1(%arg0: i32) -> (i32, i32) {
    %c0_i32 = arith.constant 0 : i32
    %c0_i32_0 = arith.constant 0 : i32
    %c0_i32_1 = arith.constant 0 : i32
    return %c0_i32, %c0_i32_0 : i32, i32
  }
  func.func @transform_2(%arg0: i32) -> (i32, i32) {
    %c0_i32 = arith.constant 0 : i32
    %c0_i32_0 = arith.constant 0 : i32
    %c0_i32_1 = arith.constant 0 : i32
    return %c0_i32, %c0_i32_0 : i32, i32
  }
  func.func @transform_3(%arg0: i32) -> (i32, i32) {
    %c0_i32 = arith.constant 0 : i32
    %c0_i32_0 = arith.constant 0 : i32
    %c0_i32_1 = arith.constant 0 : i32
    return %c0_i32, %c0_i32_0 : i32, i32
  }
  func.func @transform_4(%arg0: i32) -> (i32, i32) {
    %c0_i32 = arith.constant 0 : i32
    %c0_i32_0 = arith.constant 0 : i32
    %c0_i32_1 = arith.constant 0 : i32
    return %c0_i32, %c0_i32_0 : i32, i32
  }
  func.func @transform_5(%arg0: i32) -> (i32, i32) {
    %c0_i32 = arith.constant 0 : i32
    %c0_i32_0 = arith.constant 0 : i32
    return %arg0, %c0_i32 : i32, i32
  }
}

</mosaic_0001>

<bundles_post_ra>
// kernel: mlp_forward.1
= control target key start
LH: loop header
LB: loop body
LE: loop exit
PB: predicated region body
PF: predicated region fallthrough
CT: control target
= control target key end

     0   :  { %10 = vsyncpa [#allocation3], 0  ;;  %s524_s0 = inlined_call_operand.vmem [shape: f32[8,784], index: 0, kind: input, shape index: {}]   ;;  %s525_s1 = inlined_call_operand.hbm [shape: f32[784,128], index: 1, kind: input, shape index: {}]   ;;  %s526_s2 = inlined_call_operand.vmem [shape: f32[1,128], index: 2, kind: input, shape index: {}]   ;;  %s527_s3 = inlined_call_operand.vmem [shape: f32[128,10], index: 3, kind: input, shape index: {}]   ;;  %s528_s4 = inlined_call_operand.vmem [shape: f32[1,10], index: 4, kind: input, shape index: {}]   ;;  %s529_s5 = inlined_call_operand.hbm [shape: f32[8,10], index: 5, kind: output, shape index: {}]  }
   0x1   :  { %11 = vsyncpa [#allocation4], 0  ;;  %s18_s20 = sshll.u32 %s525_s1, 4  ;;  %s409_s21 = smov [#allocation2]   ;;  %s19_s20 = int_to_ptr.hbm [resolvable:$true] %s18_s20 }
   0x2   :  { %s20_s22 = sshll.u32 %s409_s21, 4  ;;  %s410_s23 = smov 128   ;;  %s21_s22 = int_to_ptr.vmem [resolvable:$true] %s20_s22 }
   0x3   :  { %s411_s24 = smov 8  }
   0x4   :  { %26 = dma.hbm_to_vmem [thread:$0]  %s19_s20, 12544, %s21_s22, [#allocation3], %s410_s23, %s410_s23, %s411_s24  }
   0x5   :  { %405 = dma.done.wait [#allocation3], 12544  }
   0x6   :  { %406 = vsyncadd [#allocation3], 4294954752  ;;  %v59_v0 = vld [vmem:[#allocation2 + $0x78] sm:$0xff]  ;;  %v58_v1 = vld [vmem:[#allocation2 + $0x70] sm:$0xff]  ;;  %vm146_vm0 = vcmask 130048   ;;  %s340_s24 = sshll.u32 %s529_s5, 4  ;;  %s341_s24 = int_to_ptr.hbm [resolvable:$true] %s340_s24 }
   0x7   :  { %v75_v2 = vld [vmem:[#allocation2 + $0xf8] sm:$0xff]  ;;  %150 = vmatpush.msra.mxu0 %v59_v0  ;;  %v74_v3 = vld [vmem:[#allocation2 + $0xf0] sm:$0xff]  ;;  %v57_v4 = vld [vmem:[#allocation2 + $0x68] sm:$0xff]  ;;  %vm331_vm1 = vcmask 80896  }
   0x8   :  { %170 = vmatpush.msra.mxu1 %v75_v2  ;;  %v73_v5 = vld [vmem:[#allocation2 + $0xe8] sm:$0xff]  ;;  %v56_v6 = vld [vmem:[#allocation2 + $0x60] sm:$0xff]  ;;  %v55_v8 = vld [vmem:[#allocation2 + $0x58] sm:$0xff] }
   0x9   :  { %151 = vmatpush.msra.mxu0 %v58_v1  ;;  %v72_v7 = vld [vmem:[#allocation2 + $0xe0] sm:$0xff]  ;;  %v71_v9 = vld [vmem:[#allocation2 + $0xd8] sm:$0xff]  ;;  %v54_v10 = vld [vmem:[#allocation2 + $0x50] sm:$0xff] }
   0xa   :  { %171 = vmatpush.msra.mxu1 %v74_v3  ;;  %v91_v11 = vld [vmem:[#allocation2 + $0x178] sm:$0xff]  ;;  %v70_v12 = vld [vmem:[#allocation2 + $0xd0] sm:$0xff]  ;;  %v89_v15 = vld [vmem:[#allocation2 + $0x168] sm:$0xff] }
   0xb   :  { %152 = vmatpush.msra.mxu0 %v57_v4  ;;  %190 = vmatpush.msra.mxu2 %v91_v11  ;;  %v90_v13 = vld [vmem:[#allocation2 + $0x170] sm:$0xff]  ;;  %v107_v14 = vld [vmem:[#allocation2 + $0x1f8] sm:$0xff]  ;;  %v53_v17 = vld [vmem:[#allocation2 + $0x48] sm:$0xff] }
   0xc   :  { %172 = vmatpush.msra.mxu1 %v73_v5  ;;  %v106_v16 = vld [vmem:[#allocation2 + $0x1f0] sm:$0xff]  ;;  %v69_v18 = vld [vmem:[#allocation2 + $0xc8] sm:$0xff]  ;;  %210 = vmatpush.msra.mxu3 %v107_v14  ;;  %v88_v19 = vld [vmem:[#allocation2 + $0x160] sm:$0xff] }
   0xd   :  { %153 = vmatpush.msra.mxu0 %v56_v6  ;;  %191 = vmatpush.msra.mxu2 %v90_v13  ;;  %v105_v20 = vld [vmem:[#allocation2 + $0x1e8] sm:$0xff]  ;;  %v52_v21 = vld [vmem:[#allocation2 + $0x40] sm:$0xff]  ;;  %v87_v23 = vld [vmem:[#allocation2 + $0x158] sm:$0xff] }
   0xe   :  { %173 = vmatpush.msra.mxu1 %v72_v7  ;;  %v68_v22 = vld [vmem:[#allocation2 + $0xc0] sm:$0xff]  ;;  %211 = vmatpush.msra.mxu3 %v106_v16  ;;  %v51_v25 = vld [vmem:[#allocation2 + $0x38] sm:$0xff]  ;;  %v86_v27 = vld [vmem:[#allocation2 + $0x150] sm:$0xff] }
   0xf   :  { %154 = vmatpush.msra.mxu0 %v55_v8  ;;  %192 = vmatpush.msra.mxu2 %v89_v15  ;;  %v104_v24 = vld [vmem:[#allocation2 + $0x1e0] sm:$0xff]  ;;  %v67_v26 = vld [vmem:[#allocation2 + $0xb8] sm:$0xff]  ;;  %v50_v29 = vld [vmem:[#allocation2 + $0x30] sm:$0xff] }
  0x10   :  { %174 = vmatpush.msra.mxu1 %v71_v9  ;;  %212 = vmatpush.msra.mxu3 %v105_v20  ;;  %v103_v28 = vld [vmem:[#allocation2 + $0x1d8] sm:$0xff]  ;;  %v66_v30 = vld [vmem:[#allocation2 + $0xb0] sm:$0xff]  ;;  %v85_v31 = vld [vmem:[#allocation2 + $0x148] sm:$0xff] }
  0x11   :  { %155 = vmatpush.msra.mxu0 %v54_v10  ;;  %193 = vmatpush.msra.mxu2 %v88_v19  ;;  %v102_v32 = vld [vmem:[#allocation2 + $0x1d0] sm:$0xff]  ;;  %v49_v33 = vld [vmem:[#allocation2 + $0x28] sm:$0xff]  ;;  %v84_v35 = vld [vmem:[#allocation2 + $0x140] sm:$0xff] }
  0x12   :  { %175 = vmatpush.msra.mxu1 %v70_v12  ;;  %213 = vmatpush.msra.mxu3 %v104_v24  ;;  %v65_v34 = vld [vmem:[#allocation2 + $0xa8] sm:$0xff]  ;;  %v48_v37 = vld [vmem:[#allocation2 + $0x20] sm:$0xff]  ;;  %v83_v39 = vld [vmem:[#allocation2 + $0x138] sm:$0xff] }
  0x13   :  { %156 = vmatpush.msra.mxu0 %v53_v17  ;;  %194 = vmatpush.msra.mxu2 %v87_v23  ;;  %v101_v36 = vld [vmem:[#allocation2 + $0x1c8] sm:$0xff]  ;;  %v64_v38 = vld [vmem:[#allocation2 + $0xa0] sm:$0xff]  ;;  %v47_v41 = vld [vmem:[#allocation2 + $0x18] sm:$0xff] }
  0x14   :  { %176 = vmatpush.msra.mxu1 %v69_v18  ;;  %214 = vmatpush.msra.mxu3 %v103_v28  ;;  %v100_v40 = vld [vmem:[#allocation2 + $0x1c0] sm:$0xff]  ;;  %v63_v42 = vld [vmem:[#allocation2 + $0x98] sm:$0xff]  ;;  %v82_v43 = vld [vmem:[#allocation2 + $0x130] sm:$0xff] }
  0x15   :  { %157 = vmatpush.msra.mxu0 %v52_v21  ;;  %195 = vmatpush.msra.mxu2 %v86_v27  ;;  %v99_v44 = vld [vmem:[#allocation2 + $0x1b8] sm:$0xff]  ;;  %v46_v45 = vld [vmem:[#allocation2 + $0x10] sm:$0xff]  ;;  %v81_v47 = vld [vmem:[#allocation2 + $0x128] sm:$0xff] }
  0x16   :  { %177 = vmatpush.msra.mxu1 %v68_v22  ;;  %215 = vmatpush.msra.mxu3 %v102_v32  ;;  %v62_v46 = vld [vmem:[#allocation2 + $0x90] sm:$0xff]  ;;  %v45_v49 = vld [vmem:[#allocation2 + $0x8] sm:$0xff]  ;;  %v80_v51 = vld [vmem:[#allocation2 + $0x120] sm:$0xff] }
  0x17   :  { %158 = vmatpush.msra.mxu0 %v51_v25  ;;  %196 = vmatpush.msra.mxu2 %v85_v31  ;;  %v98_v48 = vld [vmem:[#allocation2 + $0x1b0] sm:$0xff]  ;;  %v61_v50 = vld [vmem:[#allocation2 + $0x88] sm:$0xff]  ;;  %v44_v53 = vld [vmem:[#allocation2] sm:$0xff] }
  0x18   :  { %178 = vmatpush.msra.mxu1 %v67_v26  ;;  %216 = vmatpush.msra.mxu3 %v101_v36  ;;  %v97_v52 = vld [vmem:[#allocation2 + $0x1a8] sm:$0xff]  ;;  %v60_v54 = vld [vmem:[#allocation2 + $0x80] sm:$0xff]  ;;  %v123_v55 = vld [vmem:[#allocation2 + $0x278] sm:$0xff] }
  0x19   :  { %159 = vmatpush.msra.mxu0 %v50_v29  ;;  %197 = vmatpush.msra.mxu2 %v84_v35  ;;  %v139_v56 = vld [vmem:[#allocation2 + $0x2f8] sm:$0xff]  ;;  %v96_v58 = vld [vmem:[#allocation2 + $0x1a0] sm:$0xff]  ;;  %v122_v59 = vld [vmem:[#allocation2 + $0x270] sm:$0xff] }
  0x1a   :  { %179 = vmatpush.msra.mxu1 %v66_v30  ;;  %217 = vmatpush.msra.mxu3 %v100_v40  ;;  %v79_v57 = vld [vmem:[#allocation2 + $0x118] sm:$0xff]  ;;  %v138_v60 = vld [vmem:[#allocation2 + $0x2f0] sm:$0xff]  ;;  %v121_v63 = vld [vmem:[#allocation2 + $0x268] sm:$0xff] }
  0x1b   :  { %160 = vmatpush.msra.mxu0 %v49_v33  ;;  %198 = vmatpush.msra.mxu2 %v83_v39  ;;  %v78_v61 = vld [vmem:[#allocation2 + $0x110] sm:$0xff]  ;;  %v95_v62 = vld [vmem:[#allocation2 + $0x198] sm:$0xff]  ;;  %v137_v0 = vld [vmem:[#allocation2 + $0x2e8] sm:$0xff] }
  0x1c   :  { %180 = vmatpush.msra.mxu1 %v65_v34  ;;  %218 = vmatpush.msra.mxu3 %v99_v44  ;;  %v77_v1 = vld [vmem:[#allocation2 + $0x108] sm:$0xff]  ;;  %v94_v2 = vld [vmem:[#allocation2 + $0x190] sm:$0xff]  ;;  %v120_v3 = vld [vmem:[#allocation2 + $0x260] sm:$0xff] }
  0x1d   :  { %161 = vmatpush.msra.mxu0 %v48_v37  ;;  %199 = vmatpush.msra.mxu2 %v82_v43  ;;  %v136_v4 = vld [vmem:[#allocation2 + $0x2e0] sm:$0xff]  ;;  %v93_v6 = vld [vmem:[#allocation2 + $0x188] sm:$0xff]  ;;  %v119_v7 = vld [vmem:[#allocation2 + $0x258] sm:$0xff] }
  0x1e   :  { %181 = vmatpush.msra.mxu1 %v64_v38  ;;  %219 = vmatpush.msra.mxu3 %v98_v48  ;;  %v76_v5 = vld [vmem:[#allocation2 + $0x100] sm:$0xff]  ;;  %v135_v8 = vld [vmem:[#allocation2 + $0x2d8] sm:$0xff]  ;;  %v39_v9 = vld [vmem:[%s524_s0 + $0x10] sm:$0xff] }
  0x1f   :  { %162 = vmatpush.msra.mxu0 %v47_v41  ;;  %200 = vmatpush.msra.mxu2 %v81_v47  ;;  %v92_v10 = vld [vmem:[#allocation2 + $0x180] sm:$0xff]  ;;  %v118_v11 = vld [vmem:[#allocation2 + $0x250] sm:$0xff]  ;;  %v141_v13 = vld [vmem:[#allocation2 + $0x308] sm:$0xff] }
  0x20   :  { %182 = vmatpush.msra.mxu1 %v63_v42  ;;  %220 = vmatpush.msra.mxu3 %v97_v52  ;;  %v134_v12 = vld [vmem:[#allocation2 + $0x2d0] sm:$0xff]  ;;  %v37_v14 = vld [vmem:[%s524_s0] sm:$0xff]  ;;  %v117_v15 = vld [vmem:[#allocation2 + $0x248] sm:$0xff] }
  0x21   :  { %163 = vmatpush.msra.mxu0 %v46_v45  ;;  %201 = vmatpush.msra.mxu2 %v80_v51  ;;  %v133_v16 = vld [vmem:[#allocation2 + $0x2c8] sm:$0xff]  ;;  %v40_v17 = vld [vmem:[%s524_s0 + $0x18] sm:$0xff]  ;;  %v116_v19 = vld [vmem:[#allocation2 + $0x240] sm:$0xff] }
  0x22   :  { %183 = vmatpush.msra.mxu1 %v62_v46  ;;  %221 = vmatpush.msra.mxu3 %v96_v58  ;;  %v38_v18 = vld [vmem:[%s524_s0 + $0x8] sm:$0xff]  ;;  %v132_v20 = vld [vmem:[#allocation2 + $0x2c0] sm:$0xff]  ;;  %v306_v22 = vld [vmem:[%s527_s3 + $0x78] sm:$0xff] }
  0x23   :  { %164 = vmatpush.msra.mxu0 %v45_v49  ;;  %202 = vmatpush.msra.mxu2 %v79_v57  ;;  %v140_v21 = vld [vmem:[#allocation2 + $0x300] sm:$0xff]  ;;  %v115_v23 = vld [vmem:[#allocation2 + $0x238] sm:$0xff]  ;;  %v43_v25 = vld [vmem:[%s524_s0 + $0x30] sm:$0xff] }
  0x24   :  { %184 = vmatpush.msra.mxu1 %v61_v50  ;;  %222 = vmatpush.msra.mxu3 %v95_v62  ;;  %v131_v24 = vld [vmem:[#allocation2 + $0x2b8] sm:$0xff]  ;;  %v305_v26 = vld [vmem:[%s527_s3 + $0x70] sm:$0xff]  ;;  %v304_v29 = vld [vmem:[%s527_s3 + $0x68] sm:$0xff] }
  0x25   :  { %165 = vmatpush.msra.mxu0 %v44_v53  ;;  %203 = vmatpush.msra.mxu2 %v78_v61  ;;  %v114_v27 = vld [vmem:[#allocation2 + $0x230] sm:$0xff]  ;;  %v113_v30 = vld [vmem:[#allocation2 + $0x228] sm:$0xff]  ;;  %v303_v32 = vld [vmem:[%s527_s3 + $0x60] sm:$0xff] }
  0x26   :  { %185 = vmatpush.msra.mxu1 %v60_v54  ;;  %223 = vmatpush.msra.mxu3 %v94_v2  ;;  %v130_v28 = vld [vmem:[#allocation2 + $0x2b0] sm:$0xff]  ;;  %v129_v31 = vld [vmem:[#allocation2 + $0x2a8] sm:$0xff]  ;;  %v112_v33 = vld [vmem:[#allocation2 + $0x220] sm:$0xff] }
  0x27   :  { %230 = vmatpush.msrb.mxu0 %v123_v55  ;;  %204 = vmatpush.msra.mxu2 %v77_v1  ;;  %v128_v34 = vld [vmem:[#allocation2 + $0x2a0] sm:$0xff]  ;;  %v302_v35 = vld [vmem:[%s527_s3 + $0x58] sm:$0xff]  ;;  %v301_v38 = vld [vmem:[%s527_s3 + $0x50] sm:$0xff] }
  0x28   :  { %250 = vmatpush.msrb.mxu1 %v139_v56  ;;  %224 = vmatpush.msra.mxu3 %v93_v6  ;;  %v111_v36 = vld [vmem:[#allocation2 + $0x218] sm:$0xff]  ;;  %v110_v39 = vld [vmem:[#allocation2 + $0x210] sm:$0xff]  ;;  %v300_v41 = vld [vmem:[%s527_s3 + $0x48] sm:$0xff] }
  0x29   :  { %231 = vmatpush.msrb.mxu0 %v122_v59  ;;  %205 = vmatpush.msra.mxu2 %v76_v5  ;;  %v127_v37 = vld [vmem:[#allocation2 + $0x298] sm:$0xff]  ;;  %v126_v40 = vld [vmem:[#allocation2 + $0x290] sm:$0xff]  ;;  %v109_v42 = vld [vmem:[#allocation2 + $0x208] sm:$0xff] }
  0x2a   :  { %251 = vmatpush.msrb.mxu1 %v138_v60  ;;  %206 = vmatmul.f32.vlgmr.msra.gmra.mxu2 %v39_v9  ;;  %v125_v43 = vld [vmem:[#allocation2 + $0x288] sm:$0xff]  ;;  %v108_v44 = vld [vmem:[#allocation2 + $0x200] sm:$0xff]  ;;  %v298_v49 = vld [vmem:[%s527_s3 + $0x38] sm:$0xff] }
  0x2b   :  { %232 = vmatpush.msrb.mxu0 %v121_v63  ;;  %225 = vmatpush.msra.mxu3 %v92_v10  ;;  %v124_v45 = vld [vmem:[#allocation2 + $0x280] sm:$0xff]  ;;  %v42_v47 = vld [vmem:[%s524_s0 + $0x28] sm:$0xff]  ;;  %v297_v50 = vld [vmem:[%s527_s3 + $0x30] sm:$0xff] }
  0x2c   :  { %252 = vmatpush.msrb.mxu1 %v137_v0  ;;  %284 = vmatpush.msrb.mxu2 %v141_v13  ;;  %v41_v46 = vld [vmem:[%s524_s0 + $0x20] sm:$0xff]  ;;  %v296_v51 = vld [vmem:[%s527_s3 + $0x28] sm:$0xff]  ;;  %v294_v53 = vld [vmem:[%s527_s3 + $0x18] sm:$0xff] }
  0x2d   :  { %233 = vmatpush.msrb.mxu0 %v120_v3  ;;  %226 = vmatmul.f32.vlgmr.msra.gmra.mxu3 %v40_v17  ;;  %v299_v48 = vld [vmem:[%s527_s3 + $0x40] sm:$0xff]  ;;  %v293_v54 = vld [vmem:[%s527_s3 + $0x10] sm:$0xff]  ;;  %v292_v55 = vld [vmem:[%s527_s3 + $0x8] sm:$0xff] }
  0x2e   :  { %253 = vmatpush.msrb.mxu1 %v136_v4  ;;  %166 = vmatmul.f32.vlgmr.msra.gmra.mxu0 %v37_v14  ;;  %v295_v52 = vld [vmem:[%s527_s3 + $0x20] sm:$0xff] }
  0x2f   :  { %234 = vmatpush.msrb.mxu0 %v119_v7  ;;  %186 = vmatmul.f32.vlgmr.msra.gmra.mxu1 %v38_v18  ;;  %v291_v56 = vld [vmem:[%s527_s3] sm:$0xff] }
  0x30   :  { %254 = vmatpush.msrb.mxu1 %v135_v8  ;;  %285 = vmatpush.msrb.mxu2 %v140_v21  ;;  %v355_v57 = vld [vmem:[%s526_s2] ss:$0 sm:$0xff]  ;;  %s412_s2 = smov [#allocation5]  }
  0x31   :  { %235 = vmatpush.msrb.mxu0 %v118_v11  ;;  %311 = vmatpush.msrb.mxu3 %v306_v22  ;;  %v356_v9 = vld [vmem:[%s528_s4] ss:$0 sm:$0xff]  ;;  %s338_s21 = sshll.u32 %s412_s2, 4  ;;  %s339_s21 = int_to_ptr.vmem [resolvable:$true] %s338_s21 }
  0x32   :  { %255 = vmatpush.msrb.mxu1 %v134_v12  ;;  %350 = vmatmul.msk.f32.vlgmr.msrb.gmra.mxu2 %vm146_vm0, %v43_v25 }
  0x33   :  { %236 = vmatpush.msrb.mxu0 %v117_v15  ;;  %312 = vmatpush.msrb.mxu3 %v305_v26 }
  0x34   :  { %256 = vmatpush.msrb.mxu1 %v133_v16 }
  0x35   :  { %237 = vmatpush.msrb.mxu0 %v116_v19  ;;  %313 = vmatpush.msrb.mxu3 %v304_v29 }
  0x36   :  { %257 = vmatpush.msrb.mxu1 %v132_v20 }
  0x37   :  { %238 = vmatpush.msrb.mxu0 %v115_v23  ;;  %314 = vmatpush.msrb.mxu3 %v303_v32 }
  0x38   :  { %258 = vmatpush.msrb.mxu1 %v131_v24 }
  0x39   :  { %239 = vmatpush.msrb.mxu0 %v114_v27  ;;  %315 = vmatpush.msrb.mxu3 %v302_v35 }
  0x3a   :  { %259 = vmatpush.msrb.mxu1 %v130_v28 }
  0x3b   :  { %240 = vmatpush.msrb.mxu0 %v113_v30  ;;  %316 = vmatpush.msrb.mxu3 %v301_v38 }
  0x3c   :  { %260 = vmatpush.msrb.mxu1 %v129_v31 }
  0x3d   :  { %241 = vmatpush.msrb.mxu0 %v112_v33  ;;  %317 = vmatpush.msrb.mxu3 %v300_v41 }
  0x3e   :  { %261 = vmatpush.msrb.mxu1 %v128_v34 }
  0x3f   :  { %242 = vmatpush.msrb.mxu0 %v111_v36  ;;  %318 = vmatpush.msrb.mxu3 %v299_v48 }
  0x40   :  { %262 = vmatpush.msrb.mxu1 %v127_v37 }
  0x41   :  { %243 = vmatpush.msrb.mxu0 %v110_v39  ;;  %319 = vmatpush.msrb.mxu3 %v298_v49 }
  0x42   :  { %263 = vmatpush.msrb.mxu1 %v126_v40 }
  0x43   :  { %244 = vmatpush.msrb.mxu0 %v109_v42  ;;  %320 = vmatpush.msrb.mxu3 %v297_v50 }
  0x44   :  { %264 = vmatpush.msrb.mxu1 %v125_v43 }
  0x45   :  { %245 = vmatpush.msrb.mxu0 %v108_v44  ;;  %321 = vmatpush.msrb.mxu3 %v296_v51 }
  0x46   :  { %265 = vmatpush.msrb.mxu1 %v124_v45  ;;  %246 = vmatmul.f32.vlgmr.msrb.gmra.mxu0 %v41_v46 }
  0x47   :  { %266 = vmatmul.f32.vlgmr.msrb.gmra.mxu1 %v42_v47  ;;  %322 = vmatpush.msrb.mxu3 %v295_v52 }
  0x49   :  { %323 = vmatpush.msrb.mxu3 %v294_v53 }
  0x4b   :  { %324 = vmatpush.msrb.mxu3 %v293_v54 }
  0x4d   :  { %325 = vmatpush.msrb.mxu3 %v292_v55 }
  0x4f   :  { %326 = vmatpush.msrb.mxu3 %v291_v56 }
  0xab   :  { %v167_v58 = vpop.f32.mrf.mxu0 }
  0xac   :  { %v168_v59 = vadd.f32 %v355_v57, %v167_v58  ;;  %v187_v60 = vpop.f32.mrf.mxu1 }
  0xad   :  { %v207_v62 = vpop.f32.mrf.mxu2 }
  0xae   :  { %v188_v61 = vadd.f32 %v187_v60, %v168_v59 }
  0xb0   :  { %v208_v63 = vadd.f32 %v207_v62, %v188_v61  ;;  %v227_v0 = vpop.f32.mrf.mxu3 }
  0xb2   :  { %v228_v1 = vadd.f32 %v227_v0, %v208_v63 }
  0xb5   :  { %v287_v5 = vpop.f32.mrf.mxu2 }
  0xc3   :  { %v247_v2 = vpop.f32.mrf.mxu0 }
  0xc4   :  { %v267_v3 = vpop.f32.mrf.mxu1  ;;  %v248_v4 = vadd.f32 %v247_v2, %v228_v1 }
  0xc6   :  { %v268_v6 = vadd.f32 %v267_v3, %v248_v4 }
  0xc8   :  { %v288_v7 = vadd.f32 %v287_v5, %v268_v6 }
  0xca   :  { %v290_v8 = vmax.f32 %v288_v7, 0.0 }
  0xcc   :  { %327 = vmatmul.f32.vlgmr.msrb.gmra.mxu3 %v290_v8 }
 0x14f   :  { %v328_v10 = vpop.f32.mrf.mxu3 }
 0x150   :  { %v329_v11 = vadd.f32 %v356_v9, %v328_v10 }
 0x152   :  { %332 = vst.msk [vmem:[#allocation5] sm:$0xff] %vm331_vm1, %v329_v11 }
 0x153   :  { %343 = dma.vmem_to_hbm [thread:$0]  %s339_s21, 128, %s341_s24, [#allocation4]  }
 0x154   :  { %407 = dma.done.wait [#allocation4], 128  }
 0x155   :  { %408 = vsyncadd [#allocation4], 4294967168 }
 0x156   :  { %348 = vsyncpa [#allocation3], 1 }
 0x157   :  { %349 = vsyncpa [#allocation4], 1 }

</bundles_post_ra>
